<compile_context>
chip_gen: v7x
topology: tpu7x:2x2x1
jax: 0.10.0
libtpu: 0.0.40
codegen_flags: <defaults>
</compile_context>

<pallas_src>
import functools

import jax
import jax.numpy as jnp
from jax import lax
from jax.experimental import pallas as pl
from jax.experimental.pallas import tpu as pltpu


def _dsc_kernel(x_ref, wd_ref, wp_ref, o_ref, *, K, W, C):
    # x_ref:  (1, C, L)    lane-dense activations, L = G*H*W (padded to 128k)
    # wd_ref: (C, K*K)     depthwise taps, one column per tap (row-major di,dj)
    # wp_ref: (Cout, C)    pointwise weights
    x = x_ref[0].astype(jnp.float32)                     # (C, L)
    L = x.shape[1]
    wd = wd_ref[...].astype(jnp.float32)                 # (C, K*K), loaded once

    # ---- depthwise KxK, stride 1, VALID ----
    # Flat shift for tap (di, dj) is s = di*W + dj.  shifted[p] = x[(p+s) % L];
    # every valid output position stays inside its own image's HW segment, so
    # wrapped lanes only land in columns the wrapper slices away.
    acc = x * wd[:, 0:1]                                  # tap (0,0): no shift
    for di in range(K):
        for dj in range(K):
            if di == 0 and dj == 0:
                continue
            s = di * W + dj
            t = di * K + dj
            shifted = pltpu.roll(x, L - s, axis=1)        # == x[(p + s) % L]
            acc = acc + shifted * wd[:, t:t + 1]

    # ---- pointwise 1x1 conv: channel contraction ----
    wp = wp_ref[...].astype(jnp.float32)                  # (Cout, C)
    if C <= 16:
        # Tiny contraction dim: exact-f32 VPU sum (MXU would be <4% utilized
        # and f32 HIGHEST would force a multi-pass bf16 decomposition).
        out = wp[:, 0:1] * acc[0:1, :]
        for c in range(1, C):
            out = out + wp[:, c:c + 1] * acc[c:c + 1, :]
    else:
        out = jnp.dot(wp, acc,
                      preferred_element_type=jnp.float32,
                      precision=jax.lax.Precision.HIGHEST)
    o_ref[...] = out[None].astype(o_ref.dtype)            # (1, Cout, L)


def _tensorcores_per_chip():
    """2 on v7x (so both TCs get a grid step), else 1 (extra steps = overhead)."""
    try:
        kind = jax.devices()[0].device_kind.lower()
    except Exception:
        return 1
    return 2 if ("v7" in kind or "7x" in kind) else 1


def depthwise_separable_conv(x, wd, wp, *, kernel_size=3, stride=1,
                             num_groups=None):
    """x: (N, Cin, H, W); wd: (Cin, 1, K, K); wp: (Cout, Cin, 1, 1)."""
    assert stride == 1, "module is instantiated with stride=1"
    N, C, H, W = x.shape
    K = kernel_size
    Cout = wp.shape[0]
    Ho, Wo = H - (K - 1), W - (K - 1)      # VALID (module drops `padding`)
    HW = H * W

    if num_groups is None:
        num_groups = 2 if (_tensorcores_per_chip() >= 2 and N % 2 == 0) else 1
    if N % num_groups != 0:
        num_groups = 1
    G = N // num_groups                     # images packed per grid step
    L = G * HW
    Lp = ((L + 127) // 128) * 128           # keep stores lane-dense / unmasked

    # (N, C, H, W) -> (num_groups, C, G*H*W): batch packed into the lane axis.
    x_g = (x.reshape(num_groups, G, C, HW)
             .transpose(0, 2, 1, 3)
             .reshape(num_groups, C, L))
    if Lp != L:
        x_g = jnp.pad(x_g, ((0, 0), (0, 0), (0, Lp - L)))

    # Depthwise weights: (Cin, 1, K, K) -> (C, K*K); tap t = di*K + dj.
    wd_k = wd.reshape(C, K * K)
    # Pointwise weights: (Cout, Cin, 1, 1) -> (Cout, Cin).
    wp2 = wp.reshape(Cout, C)

    kernel = functools.partial(_dsc_kernel, K=K, W=W, C=C)

    out_flat = pl.pallas_call(
        kernel,
        out_shape=jax.ShapeDtypeStruct((num_groups, Cout, Lp), x.dtype),
        grid_spec=pltpu.PrefetchScalarGridSpec(
            num_scalar_prefetch=0,
            grid=(num_groups,),
            in_specs=[
                pl.BlockSpec((1, C, Lp), lambda g: (g, 0, 0)),
                pl.BlockSpec((C, K * K), lambda g: (0, 0)),
                pl.BlockSpec((Cout, C), lambda g: (0, 0)),
            ],
            out_specs=pl.BlockSpec((1, Cout, Lp), lambda g: (g, 0, 0)),
        ),
        compiler_params=pltpu.CompilerParams(
            dimension_semantics=("parallel",)),
    )(x_g, wd_k, wp2)

    # Lane-dense flat output -> NCHW VALID window (layout plumbing in XLA).
    out = out_flat[:, :, :L].reshape(num_groups, Cout, G, H, W)
    out = out.transpose(0, 2, 1, 3, 4).reshape(N, Cout, H, W)
    return out[:, :, :Ho, :Wo]


def _reference(x, wd, wp):
    C = x.shape[1]
    dn = ("NCHW", "OIHW", "NCHW")
    y = lax.conv_general_dilated(
        x, wd, window_strides=(1, 1), padding="VALID", dimension_numbers=dn,
        feature_group_count=C, precision=lax.Precision.HIGHEST)
    return lax.conv_general_dilated(
        y, wp, window_strides=(1, 1), padding="VALID", dimension_numbers=dn,
        precision=lax.Precision.HIGHEST)


if __name__ == "__main__":
    key = jax.random.PRNGKey(0)
    kx, kd, kp = jax.random.split(key, 3)

    N, Cin, Cout, H, W, K = 2, 4, 8, 16, 16, 3

    x = jax.random.normal(kx, (N, Cin, H, W), dtype=jnp.float32)
    # Deterministic synthetic parameters matching nn.Conv2d weight shapes:
    wd = jax.random.normal(kd, (Cin, 1, K, K), dtype=jnp.float32) * 0.1     # depthwise
    wp = jax.random.normal(kp, (Cout, Cin, 1, 1), dtype=jnp.float32) * 0.1  # pointwise

    out = depthwise_separable_conv(x, wd, wp, kernel_size=K, stride=1)
    out = jax.block_until_ready(out)

    ref = _reference(x, wd, wp)
    assert out.shape == (N, Cout, H - K + 1, W - K + 1), out.shape
    assert jnp.allclose(out, ref, atol=1e-4, rtol=1e-4), "mismatch vs reference"

    print("KERNEL_OK")
</pallas_src>

<mosaic_0001>
module attributes {stable_mosaic.version = 11 : i64} {
  func.func @_dsc_kernel(%arg0: i32, %arg1: memref<1x4x512xf32, #tpu.memory_space<vmem>>, %arg2: memref<4x9xf32, #tpu.memory_space<vmem>>, %arg3: memref<8x4xf32, #tpu.memory_space<vmem>>, %arg4: memref<1x8x512xf32, #tpu.memory_space<vmem>>) attributes {dimension_semantics = [#tpu.dimension_semantics<parallel>], iteration_bounds = array<i64: 1>, scalar_prefetch = 0 : i64, scratch_operands = 0 : i64, tpu.core_type = #tpu.core_type<tc>, window_params = [{transform_indices = @transform_0, window_bounds = array<i64: 1, 4, 512>}, {pipeline_mode = #tpu.pipeline_mode<synchronous>, transform_indices = @transform_1, window_bounds = array<i64: 4, 9>}, {pipeline_mode = #tpu.pipeline_mode<synchronous>, transform_indices = @transform_2, window_bounds = array<i64: 8, 4>}, {transform_indices = @transform_3, window_bounds = array<i64: 1, 8, 512>}]} {
    %c0 = arith.constant 0 : index
    %c0_0 = arith.constant 0 : index
    %c0_1 = arith.constant 0 : index
    %0 = vector.load %arg1[%c0, %c0_0, %c0_1] : memref<1x4x512xf32, #tpu.memory_space<vmem>>, vector<1x4x512xf32>
    %1 = vector.shape_cast %0 : vector<1x4x512xf32> to vector<4x512xf32>
    %c0_2 = arith.constant 0 : index
    %c0_3 = arith.constant 0 : index
    %2 = vector.load %arg2[%c0_2, %c0_3] : memref<4x9xf32, #tpu.memory_space<vmem>>, vector<4x9xf32>
    %3 = vector.extract_strided_slice %2 {offsets = [0, 0], sizes = [4, 1], strides = [1, 1]} : vector<4x9xf32> to vector<4x1xf32>
    %4 = vector.broadcast %3 : vector<4x1xf32> to vector<4x512xf32>
    %5 = arith.mulf %1, %4 : vector<4x512xf32>
    %c511_i32 = arith.constant 511 : i32
    %6 = tpu.dynamic_rotate %1 by %c511_i32 dim 1 : vector<4x512xf32>, i32 -> vector<4x512xf32>
    %7 = vector.extract_strided_slice %2 {offsets = [0, 1], sizes = [4, 1], strides = [1, 1]} : vector<4x9xf32> to vector<4x1xf32>
    %8 = vector.broadcast %7 : vector<4x1xf32> to vector<4x512xf32>
    %9 = arith.mulf %6, %8 : vector<4x512xf32>
    %10 = arith.addf %5, %9 : vector<4x512xf32>
    %c510_i32 = arith.constant 510 : i32
    %11 = tpu.dynamic_rotate %1 by %c510_i32 dim 1 : vector<4x512xf32>, i32 -> vector<4x512xf32>
    %12 = vector.extract_strided_slice %2 {offsets = [0, 2], sizes = [4, 1], strides = [1, 1]} : vector<4x9xf32> to vector<4x1xf32>
    %13 = vector.broadcast %12 : vector<4x1xf32> to vector<4x512xf32>
    %14 = arith.mulf %11, %13 : vector<4x512xf32>
    %15 = arith.addf %10, %14 : vector<4x512xf32>
    %c496_i32 = arith.constant 496 : i32
    %16 = tpu.dynamic_rotate %1 by %c496_i32 dim 1 : vector<4x512xf32>, i32 -> vector<4x512xf32>
    %17 = vector.extract_strided_slice %2 {offsets = [0, 3], sizes = [4, 1], strides = [1, 1]} : vector<4x9xf32> to vector<4x1xf32>
    %18 = vector.broadcast %17 : vector<4x1xf32> to vector<4x512xf32>
    %19 = arith.mulf %16, %18 : vector<4x512xf32>
    %20 = arith.addf %15, %19 : vector<4x512xf32>
    %c495_i32 = arith.constant 495 : i32
    %21 = tpu.dynamic_rotate %1 by %c495_i32 dim 1 : vector<4x512xf32>, i32 -> vector<4x512xf32>
    %22 = vector.extract_strided_slice %2 {offsets = [0, 4], sizes = [4, 1], strides = [1, 1]} : vector<4x9xf32> to vector<4x1xf32>
    %23 = vector.broadcast %22 : vector<4x1xf32> to vector<4x512xf32>
    %24 = arith.mulf %21, %23 : vector<4x512xf32>
    %25 = arith.addf %20, %24 : vector<4x512xf32>
    %c494_i32 = arith.constant 494 : i32
    %26 = tpu.dynamic_rotate %1 by %c494_i32 dim 1 : vector<4x512xf32>, i32 -> vector<4x512xf32>
    %27 = vector.extract_strided_slice %2 {offsets = [0, 5], sizes = [4, 1], strides = [1, 1]} : vector<4x9xf32> to vector<4x1xf32>
    %28 = vector.broadcast %27 : vector<4x1xf32> to vector<4x512xf32>
    %29 = arith.mulf %26, %28 : vector<4x512xf32>
    %30 = arith.addf %25, %29 : vector<4x512xf32>
    %c480_i32 = arith.constant 480 : i32
    %31 = tpu.dynamic_rotate %1 by %c480_i32 dim 1 : vector<4x512xf32>, i32 -> vector<4x512xf32>
    %32 = vector.extract_strided_slice %2 {offsets = [0, 6], sizes = [4, 1], strides = [1, 1]} : vector<4x9xf32> to vector<4x1xf32>
    %33 = vector.broadcast %32 : vector<4x1xf32> to vector<4x512xf32>
    %34 = arith.mulf %31, %33 : vector<4x512xf32>
    %35 = arith.addf %30, %34 : vector<4x512xf32>
    %c479_i32 = arith.constant 479 : i32
    %36 = tpu.dynamic_rotate %1 by %c479_i32 dim 1 : vector<4x512xf32>, i32 -> vector<4x512xf32>
    %37 = vector.extract_strided_slice %2 {offsets = [0, 7], sizes = [4, 1], strides = [1, 1]} : vector<4x9xf32> to vector<4x1xf32>
    %38 = vector.broadcast %37 : vector<4x1xf32> to vector<4x512xf32>
    %39 = arith.mulf %36, %38 : vector<4x512xf32>
    %40 = arith.addf %35, %39 : vector<4x512xf32>
    %c478_i32 = arith.constant 478 : i32
    %41 = tpu.dynamic_rotate %1 by %c478_i32 dim 1 : vector<4x512xf32>, i32 -> vector<4x512xf32>
    %42 = vector.extract_strided_slice %2 {offsets = [0, 8], sizes = [4, 1], strides = [1, 1]} : vector<4x9xf32> to vector<4x1xf32>
    %43 = vector.broadcast %42 : vector<4x1xf32> to vector<4x512xf32>
    %44 = arith.mulf %41, %43 : vector<4x512xf32>
    %45 = arith.addf %40, %44 : vector<4x512xf32>
    %c0_4 = arith.constant 0 : index
    %c0_5 = arith.constant 0 : index
    %46 = vector.load %arg3[%c0_4, %c0_5] : memref<8x4xf32, #tpu.memory_space<vmem>>, vector<8x4xf32>
    %47 = vector.extract_strided_slice %46 {offsets = [0, 0], sizes = [8, 1], strides = [1, 1]} : vector<8x4xf32> to vector<8x1xf32>
    %48 = vector.extract_strided_slice %45 {offsets = [0, 0], sizes = [1, 512], strides = [1, 1]} : vector<4x512xf32> to vector<1x512xf32>
    %49 = vector.broadcast %47 : vector<8x1xf32> to vector<8x512xf32>
    %50 = vector.broadcast %48 : vector<1x512xf32> to vector<8x512xf32>
    %51 = arith.mulf %49, %50 : vector<8x512xf32>
    %52 = vector.extract_strided_slice %46 {offsets = [0, 1], sizes = [8, 1], strides = [1, 1]} : vector<8x4xf32> to vector<8x1xf32>
    %53 = vector.extract_strided_slice %45 {offsets = [1, 0], sizes = [1, 512], strides = [1, 1]} : vector<4x512xf32> to vector<1x512xf32>
    %54 = vector.broadcast %52 : vector<8x1xf32> to vector<8x512xf32>
    %55 = vector.broadcast %53 : vector<1x512xf32> to vector<8x512xf32>
    %56 = arith.mulf %54, %55 : vector<8x512xf32>
    %57 = arith.addf %51, %56 : vector<8x512xf32>
    %58 = vector.extract_strided_slice %46 {offsets = [0, 2], sizes = [8, 1], strides = [1, 1]} : vector<8x4xf32> to vector<8x1xf32>
    %59 = vector.extract_strided_slice %45 {offsets = [2, 0], sizes = [1, 512], strides = [1, 1]} : vector<4x512xf32> to vector<1x512xf32>
    %60 = vector.broadcast %58 : vector<8x1xf32> to vector<8x512xf32>
    %61 = vector.broadcast %59 : vector<1x512xf32> to vector<8x512xf32>
    %62 = arith.mulf %60, %61 : vector<8x512xf32>
    %63 = arith.addf %57, %62 : vector<8x512xf32>
    %64 = vector.extract_strided_slice %46 {offsets = [0, 3], sizes = [8, 1], strides = [1, 1]} : vector<8x4xf32> to vector<8x1xf32>
    %65 = vector.extract_strided_slice %45 {offsets = [3, 0], sizes = [1, 512], strides = [1, 1]} : vector<4x512xf32> to vector<1x512xf32>
    %66 = vector.broadcast %64 : vector<8x1xf32> to vector<8x512xf32>
    %67 = vector.broadcast %65 : vector<1x512xf32> to vector<8x512xf32>
    %68 = arith.mulf %66, %67 : vector<8x512xf32>
    %69 = arith.addf %63, %68 : vector<8x512xf32>
    %70 = vector.shape_cast %69 : vector<8x512xf32> to vector<1x8x512xf32>
    %c0_6 = arith.constant 0 : index
    %c0_7 = arith.constant 0 : index
    %c0_8 = arith.constant 0 : index
    %71 = vector.load %arg4[%c0_6, %c0_7, %c0_8] : memref<1x8x512xf32, #tpu.memory_space<vmem>>, vector<1x8x512xf32>
    tpu.vector_store %arg4[%c0_6, %c0_7, %c0_8], %70 {strides = array<i32>} : memref<1x8x512xf32, #tpu.memory_space<vmem>>, vector<1x8x512xf32>,
    return
  }
  func.func @transform_0(%arg0: i32) -> (i32, i32, i32) {
    %c0_i32 = arith.constant 0 : i32
    %c0_i32_0 = arith.constant 0 : i32
    %c0_i32_1 = arith.constant 0 : i32
    return %arg0, %c0_i32, %c0_i32_0 : i32, i32, i32
  }
  func.func @transform_1(%arg0: i32) -> (i32, i32) {
    %c0_i32 = arith.constant 0 : i32
    %c0_i32_0 = arith.constant 0 : i32
    %c0_i32_1 = arith.constant 0 : i32
    return %c0_i32, %c0_i32_0 : i32, i32
  }
  func.func @transform_2(%arg0: i32) -> (i32, i32) {
    %c0_i32 = arith.constant 0 : i32
    %c0_i32_0 = arith.constant 0 : i32
    %c0_i32_1 = arith.constant 0 : i32
    return %c0_i32, %c0_i32_0 : i32, i32
  }
  func.func @transform_3(%arg0: i32) -> (i32, i32, i32) {
    %c0_i32 = arith.constant 0 : i32
    %c0_i32_0 = arith.constant 0 : i32
    %c0_i32_1 = arith.constant 0 : i32
    return %arg0, %c0_i32, %c0_i32_0 : i32, i32, i32
  }
}

</mosaic_0001>

<bundles_post_ra>
// kernel: tpu_custom_call.1
= control target key start
LH: loop header
LB: loop body
LE: loop exit
PB: predicated region body
PF: predicated region fallthrough
CT: control target
= control target key end

     0   :  { %8 = vsyncpa [#allocation3], 0  ;;  %s837_s0 = inlined_call_operand.hbm [shape: f32[1,4,512], index: 0, kind: input, shape index: {}]   ;;  %s838_s1 = inlined_call_operand.vmem [shape: f32[4,9], index: 1, kind: input, shape index: {}]   ;;  %s839_s2 = inlined_call_operand.vmem [shape: f32[8,4], index: 2, kind: input, shape index: {}]   ;;  %s840_s3 = inlined_call_operand.hbm [shape: f32[1,8,512], index: 3, kind: output, shape index: {}]  }
   0x1   :  { %9 = vsyncpa [#allocation4], 0  ;;  %s593_s12 = smov [#allocation2]   ;;  %s545_s16 = scalar_lea.hbm %s837_s0, 256 }
   0x2   :  { %s16_s13 = sshll.u32 %s593_s12, 4  ;;  %p546_p0 = scmp.ne.s32.totalorder %s837_s0, %s545_s16  ;;  %s17_s13 = int_to_ptr.vmem [resolvable:$true] %s16_s13 }
   0x3   :  { %p549_p1 = scmp.lt.u32.totalorder %s545_s16, %s837_s0 }
   0x5   :  { %p551_p2 = pnand %p549_p1, %p546_p0 }
   0x7   :  { %554 = shalt.err (!%p551_p2)
}
   0x8   :  { %s555_s21 = scalar_lea.vmem %s17_s13, 256  ;;  %p560_p4 = scmp.lt.s32.totalorder %s17_s13, %s17_s13 }
   0x9   :  { %p556_p3 = scmp.ne.s32.totalorder %s17_s13, %s555_s21  ;;  %p561_p5 = scmp.lt.s32.totalorder %s555_s21, %s555_s21 }
   0xb   :  { %p562_p6 = por %p561_p5, %p560_p4 }
   0xd   :  { %p563_p7 = pnand %p562_p6, %p556_p3 }
   0xf   :  { %566 = shalt.err (!%p563_p7)
}
  0x10   :  { %19 = dma.hbm_to_vmem [thread:$0]  %s837_s0, 256, %s17_s13, [#allocation3]  }
  0x11   :  { %589 = dma.done.wait [#allocation3], 256  }
  0x12   :  { %590 = vsyncadd [#allocation3], 4294967040  ;;  %v594_v0 = vmov 1   ;;  %v595_v1 = vmov 2   ;;  %v646_v2 = vld [vmem:[#allocation2 + $0x8] sm:$0xff]  ;;  %v648_v3 = vld [vmem:[#allocation2] sm:$0xff]  ;;  %v37_v15 = vlaneseq }
  0x13   :  { %531 = vset.pattern.permute.xlu1 %v594_v0  ;;  %532 = vset.pattern.permute.xlu0 %v595_v1  ;;  %s596_s24 = smov 127   ;;  %v654_v4 = vcombine.high %v646_v2, %v646_v2  ;;  %v29_v5 = vld [vmem:[%s838_s1] sm:$0xf]  ;;  %v46_v6 = vcombine.high %v648_v3, %v648_v3  ;;  %s597_s26 = smov 126   ;;  %v598_v7 = vmov 3   ;;  %v599_v8 = vmov 5  }
  0x14   :  { %54 = vrot.lane.b32.xlu1 %v646_v2, %s596_s24  ;;  %50 = vrot.lane.b32.xlu0 %v648_v3, %s596_s24  ;;  %v600_v9 = vmov 4   ;;  %s601_s1 = smov 112   ;;  %v602_v10 = vmov 6   ;;  %s603_s27 = smov 111   ;;  %v604_v11 = vmov 7   ;;  %v606_v12 = vmov 8  }
  0x15   :  { %s605_s28 = smov 110   ;;  %v607_v13 = vmov 0   ;;  %s608_s29 = smov 96   ;;  %v300_v14 = vld [vmem:[%s839_s2] sm:$0xff]  ;;  %v687_v17 = vand.u32 127, %v37_v15  ;;  %v710_v54 = vshrl.u32 %v37_v15, 7 }
  0x16   :  { %s609_s30 = smov 95   ;;  %s610_s4 = smov 94   ;;  %v611_v50 = vmov 839922192  }
  0x17   :  { %vm60_vm0 = vcmp.lt.s32.totalorder %v687_v17, 127  ;;  %v35_v51 = vunpack.c.l.s4 %v611_v50  ;;  %vm91_vm1 = vcmp.lt.s32.totalorder %v687_v17, 126  ;;  %vm122_vm2 = vcmp.lt.s32.totalorder %v687_v17, 112  ;;  %s612_s2 = smov [#allocation5]  }
  0x18   :  { %66 = vperm.xlu1 %531, %v29_v5   ;;  %56 = vrot.lane.b32.xlu0 %v654_v4, %s596_s24  ;;  %vm153_vm3 = vcmp.lt.s32.totalorder %v687_v17, 111  ;;  %vm184_vm4 = vcmp.lt.s32.totalorder %v687_v17, 110  ;;  %vm215_vm5 = vcmp.lt.s32.totalorder %v687_v17, 96  ;;  %vm246_vm6 = vcmp.lt.s32.totalorder %v687_v17, 95  ;;  %s502_s7 = sshll.u32 %s612_s2, 4  ;;  %s503_s7 = int_to_ptr.vmem [resolvable:$true] %s502_s7 }
  0x19   :  { %v36_v55 = vunpack.c.0.s8 %v35_v51  ;;  %vm277_vm7 = vcmp.lt.s32.totalorder %v687_v17, 94  ;;  %s567_s8 = scalar_lea.vmem %s503_s7, 512  ;;  %p572_p9 = scmp.lt.s32.totalorder %s503_s7, %s503_s7 }
  0x1a   :  { %p568_p8 = scmp.ne.s32.totalorder %s503_s7, %s567_s8  ;;  %p573_p10 = scmp.lt.s32.totalorder %s567_s8, %s567_s8 }
  0x1b   :  { %v39_v57 = vsub.s32 %v36_v55, %v710_v54 }
  0x1c   :  { %83 = vrot.lane.b32.xlu0 %v648_v3, %s597_s26  ;;  %52 = vrot.lane.b32.xlu1 %v46_v6, %s596_s24  ;;  %p574_p11 = por %p573_p10, %p572_p9 }
  0x1d   :  { %533 = vset.pattern.permute.xlu1 %v598_v7 }
  0x1e   :  { %p575_p12 = pnand %p574_p11, %p568_p8 }
  0x20   :  { %97 = vperm.xlu0 %532, %v29_v5   ;;  %85 = vrot.lane.b32.xlu1 %v46_v6, %s597_s26 }
  0x24   :  { %87 = vrot.lane.b32.xlu0 %v646_v2, %s597_s26  ;;  %128 = vperm.xlu1 %533, %v29_v5  }
  0x25   :  { %535 = vset.pattern.permute.xlu0 %v599_v8 }
  0x28   :  { %190 = vperm.xlu0 %535, %v29_v5   ;;  %534 = vset.pattern.permute.xlu1 %v600_v9 }
  0x29   :  { %159 = vperm.xlu1 %534, %v29_v5  }
  0x2c   :  { %118 = vrot.lane.b32.xlu0 %v646_v2, %s601_s1 }
  0x2d   :  { %89 = vrot.lane.b32.xlu1 %v654_v4, %s597_s26  ;;  %536 = vset.pattern.permute.xlu0 %v602_v10 }
  0x2e   :  { %540 = vset.pattern.permute.xlu1 %v594_v0 }
  0x30   :  { %221 = vperm.xlu0 %536, %v29_v5  }
  0x31   :  { %114 = vrot.lane.b32.xlu1 %v648_v3, %s601_s1 }
  0x34   :  { %149 = vrot.lane.b32.xlu0 %v646_v2, %s603_s27 }
  0x35   :  { %116 = vrot.lane.b32.xlu1 %v46_v6, %s601_s1  ;;  %537 = vset.pattern.permute.xlu0 %v604_v11 }
  0x38   :  { %252 = vperm.xlu0 %537, %v29_v5  }
  0x39   :  { %120 = vrot.lane.b32.xlu1 %v654_v4, %s601_s1 }
  0x3c   :  { %180 = vrot.lane.b32.xlu0 %v646_v2, %s605_s28 }
  0x3d   :  { %145 = vrot.lane.b32.xlu1 %v648_v3, %s603_s27  ;;  %538 = vset.pattern.permute.xlu0 %v606_v12 }
  0x40   :  { %283 = vperm.xlu0 %538, %v29_v5  }
  0x41   :  { %147 = vrot.lane.b32.xlu1 %v46_v6, %s603_s27 }
  0x44   :  { %539 = vset.pattern.permute.xlu0 %v607_v13 }
  0x45   :  { %32 = vperm.xlu0 %539, %v29_v5   ;;  %151 = vrot.lane.b32.xlu1 %v654_v4, %s603_s27 }
  0x49   :  { %211 = vrot.lane.b32.xlu0 %v646_v2, %s608_s29  ;;  %176 = vrot.lane.b32.xlu1 %v648_v3, %s605_s28 }
  0x4d   :  { %238 = vrot.lane.b32.xlu0 %v648_v3, %s609_s30  ;;  %178 = vrot.lane.b32.xlu1 %v46_v6, %s605_s28 }
  0x51   :  { %242 = vrot.lane.b32.xlu0 %v646_v2, %s609_s30  ;;  %182 = vrot.lane.b32.xlu1 %v654_v4, %s605_s28 }
  0x55   :  { %269 = vrot.lane.b32.xlu0 %v648_v3, %s610_s4  ;;  %207 = vrot.lane.b32.xlu1 %v648_v3, %s608_s29 }
  0x59   :  { %273 = vrot.lane.b32.xlu0 %v646_v2, %s610_s4  ;;  %209 = vrot.lane.b32.xlu1 %v46_v6, %s608_s29 }
  0x5d   :  { %303 = vperm.xlu0 %539, %v300_v14   ;;  %213 = vrot.lane.b32.xlu1 %v654_v4, %s608_s29 }
  0x61   :  { %240 = vrot.lane.b32.xlu1 %v46_v6, %s609_s30  ;;  %542 = vset.pattern.permute.xlu0 %v598_v7 }
  0x62   :  { %445 = vperm.xlu0 %542, %v300_v14  }
  0x65   :  { %244 = vrot.lane.b32.xlu1 %v654_v4, %s609_s30 }
  0x69   :  { %271 = vrot.lane.b32.xlu1 %v46_v6, %s610_s4 }
  0x6d   :  { %275 = vrot.lane.b32.xlu1 %v654_v4, %s610_s4 }
  0x71   :  { %349 = vperm.xlu1 %540, %v300_v14  }
  0x75   :  { %541 = vset.pattern.permute.xlu1 %v595_v1 }
  0x76   :  { %397 = vperm.xlu1 %541, %v300_v14  }
  0x86   :  { %v51_v16 = vpop.permute.xlu0 %50  ;;  %v55_v18 = vpop.permute.xlu1 %54 }
  0x8a   :  { %v57_v19 = vpop.permute.xlu0 %56 }
  0x8b   :  { %v64_v20 = vsel %vm60_vm0, %v57_v19, %v51_v16  ;;  %v61_v21 = vsel %vm60_vm0, %v55_v18, %v57_v19 }
  0x8e   :  { %v84_v25 = vpop.permute.xlu0 %83 }
  0x97   :  { %v67_v22 = vpop.permute.xlu1 %66 }
  0x98   :  { %v690_v23 = vmul.f32 %v67_v22, %v61_v21  ;;  %v692_v24 = vmul.f32 %v67_v22, %v64_v20 }
  0x9a   :  { %v78_v26 = vcombine.low %v690_v23, %v692_v24 }
  0x9b   :  { %v53_v27 = vpop.permute.xlu1 %52 }
  0x9c   :  { %v62_v28 = vsel %vm60_vm0, %v53_v27, %v55_v18  ;;  %v63_v29 = vsel %vm60_vm0, %v51_v16, %v53_v27 }
  0x9d   :  { %v69_v30 = vmul.f32 %v67_v22, %v63_v29  ;;  %v70_v31 = vmul.f32 %v67_v22, %v62_v28 }
  0x9f   :  { %v77_v32 = vcombine.low %v69_v30, %v70_v31  ;;  %v98_v33 = vpop.permute.xlu0 %97  ;;  %v86_v34 = vpop.permute.xlu1 %85 }
  0xa0   :  { %v94_v0 = vsel %vm91_vm1, %v84_v25, %v86_v34 }
  0xa1   :  { %v100_v5 = vmul.f32 %v98_v33, %v94_v0 }
  0xa3   :  { %v88_v35 = vpop.permute.xlu0 %87  ;;  %v129_v36 = vpop.permute.xlu1 %128 }
  0xa4   :  { %v93_v61 = vsel %vm91_vm1, %v86_v34, %v88_v35 }
  0xa5   :  { %v101_v1 = vmul.f32 %v98_v33, %v93_v61 }
  0xa7   :  { %v696_v37 = vpop.permute.xlu0 %190  ;;  %v108_v9 = vcombine.low %v100_v5, %v101_v1 }
  0xa8   :  { %v698_v38 = vpop.permute.xlu1 %159 }
  0xab   :  { %v119_v39 = vpop.permute.xlu0 %118 }
  0xac   :  { %v90_v40 = vpop.permute.xlu1 %89 }
  0xad   :  { %v92_v12 = vsel %vm91_vm1, %v88_v35, %v90_v40  ;;  %v95_v13 = vsel %vm91_vm1, %v90_v40, %v84_v25 }
  0xae   :  { %v102_v22 = vmul.f32 %v98_v33, %v92_v12  ;;  %v103_v25 = vmul.f32 %v98_v33, %v95_v13 }
  0xaf   :  { %v700_v41 = vpop.permute.xlu0 %221 }
  0xb0   :  { %v115_v42 = vpop.permute.xlu1 %114 }
  0xb3   :  { %v702_v43 = vpop.permute.xlu0 %149 }
  0xb4   :  { %v117_v44 = vpop.permute.xlu1 %116 }
  0xb5   :  { %v124_v6 = vsel %vm122_vm2, %v117_v44, %v119_v39  ;;  %v125_v7 = vsel %vm122_vm2, %v115_v42, %v117_v44 }
  0xb6   :  { %v132_v14 = vmul.f32 %v129_v36, %v124_v6 }
  0xb7   :  { %v704_v45 = vpop.permute.xlu0 %252 }
  0xb8   :  { %v121_v46 = vpop.permute.xlu1 %120 }
  0xb9   :  { %v123_v15 = vsel %vm122_vm2, %v119_v39, %v121_v46  ;;  %v126_v16 = vsel %vm122_vm2, %v121_v46, %v115_v42 }
  0xba   :  { %v133_v29 = vmul.f32 %v129_v36, %v123_v15  ;;  %v134_v30 = vmul.f32 %v129_v36, %v126_v16 }
  0xbb   :  { %v706_v48 = vpop.permute.xlu0 %180 }
  0xbc   :  { %v146_v47 = vpop.permute.xlu1 %145 }
  0xbf   :  { %v708_v52 = vpop.permute.xlu0 %283 }
  0xc0   :  { %v148_v49 = vpop.permute.xlu1 %147 }
  0xc1   :  { %v156_v18 = vsel %vm153_vm3, %v146_v47, %v148_v49  ;;  %v155_v21 = vsel %vm153_vm3, %v148_v49, %v702_v43  ;;  %v140_v49 = vcombine.low %v133_v29, %v134_v30  ;;  %v354_v29 = vsub.s32 1, %v710_v54 }
  0xc2   :  { %v162_v31 = vmul.f32 %v698_v38, %v156_v18  ;;  %v358_v30 = vsub.s32 5, %v710_v54 }
  0xc4   :  { %v152_v53 = vpop.permute.xlu1 %151  ;;  %v33_v58 = vpop.permute.xlu0 %32 }
  0xc5   :  { %v40_v60 = vrot.slane %v33_v58, %v39_v57  ;;  %v154_v42 = vsel %vm153_vm3, %v702_v43, %v152_v53  ;;  %v157_v23 = vsel %vm153_vm3, %v152_v53, %v146_v47 }
  0xc6   :  { %v164_v58 = vmul.f32 %v698_v38, %v154_v42 }
  0xc7   :  { %v42_v4 = vmul.f32 %v40_v60, %v648_v3  ;;  %v131_v3 = vmul.f32 %v129_v36, %v125_v7  ;;  %v43_v19 = vmul.f32 %v40_v60, %v646_v2  ;;  %v109_v36 = vcombine.low %v102_v22, %v103_v25 }
  0xc8   :  { %v177_v56 = vpop.permute.xlu1 %176  ;;  %v716_v62 = vpop.permute.xlu0 %211 }
  0xc9   :  { %v81_v10 = vadd.f32 %v77_v32, %v42_v4  ;;  %v139_v28 = vcombine.low %v131_v3, %v132_v14  ;;  %v163_v32 = vmul.f32 %v698_v38, %v155_v21  ;;  %v82_v2 = vadd.f32 %v78_v26, %v43_v19 }
  0xcb   :  { %v112_v27 = vadd.f32 %v108_v9, %v81_v10  ;;  %v170_v50 = vcombine.low %v162_v31, %v163_v32  ;;  %v113_v51 = vadd.f32 %v109_v36, %v82_v2  ;;  %v314_v36 = vsub.s32 4, %v710_v54 }
  0xcc   :  { %v179_v59 = vpop.permute.xlu1 %178  ;;  %v239_v11 = vpop.permute.xlu0 %238 }
  0xcd   :  { %v186_v34 = vsel %vm184_vm4, %v179_v59, %v706_v48  ;;  %v187_v33 = vsel %vm184_vm4, %v177_v56, %v179_v59  ;;  %v143_v40 = vadd.f32 %v139_v28, %v112_v27  ;;  %v165_v59 = vmul.f32 %v698_v38, %v157_v23 }
  0xce   :  { %v193_v24 = vmul.f32 %v696_v37, %v187_v33  ;;  %v194_v26 = vmul.f32 %v696_v37, %v186_v34  ;;  %v144_v9 = vadd.f32 %v140_v49, %v113_v51 }
  0xcf   :  { %v174_v1 = vadd.f32 %v170_v50, %v143_v40 }
  0xd0   :  { %v183_v63 = vpop.permute.xlu1 %182  ;;  %v243_v35 = vpop.permute.xlu0 %242 }
  0xd1   :  { %v185_v43 = vsel %vm184_vm4, %v706_v48, %v183_v63  ;;  %v188_v47 = vsel %vm184_vm4, %v183_v63, %v177_v56  ;;  %v201_v48 = vcombine.low %v193_v24, %v194_v26  ;;  %v814_v26 = vsub.s32 3, %v710_v54 }
  0xd2   :  { %v195_v4 = vmul.f32 %v696_v37, %v185_v43  ;;  %v196_v5 = vmul.f32 %v696_v37, %v188_v47  ;;  %v171_v37 = vcombine.low %v164_v58, %v165_v59  ;;  %v402_v43 = vsub.s32 2, %v710_v54 }
  0xd3   :  { %v205_v3 = vadd.f32 %v201_v48, %v174_v1  ;;  %v406_v47 = vsub.s32 6, %v710_v54 }
  0xd4   :  { %v208_v8 = vpop.permute.xlu1 %207  ;;  %v270_v60 = vpop.permute.xlu0 %269  ;;  %v202_v14 = vcombine.low %v195_v4, %v196_v5  ;;  %v175_v21 = vadd.f32 %v171_v37, %v144_v9 }
  0xd6   :  { %v206_v31 = vadd.f32 %v202_v14, %v175_v21 }
  0xd8   :  { %v210_v20 = vpop.permute.xlu1 %209  ;;  %v274_v15 = vpop.permute.xlu0 %273 }
  0xd9   :  { %v217_v44 = vsel %vm215_vm5, %v210_v20, %v716_v62  ;;  %v218_v46 = vsel %vm215_vm5, %v208_v8, %v210_v20 }
  0xda   :  { %v224_v61 = vmul.f32 %v700_v41, %v218_v46  ;;  %v225_v0 = vmul.f32 %v700_v41, %v217_v44  ;;  %v454_v44 = vsub.s32 7, %v710_v54 }
  0xdc   :  { %v214_v39 = vpop.permute.xlu1 %213 }
  0xdd   :  { %v216_v56 = vsel %vm215_vm5, %v716_v62, %v214_v39  ;;  %v219_v63 = vsel %vm215_vm5, %v214_v39, %v208_v8  ;;  %v232_v62 = vcombine.low %v224_v61, %v225_v0  ;;  %v310_v39 = vsub.s32 0, %v710_v54 }
  0xde   :  { %v226_v13 = vmul.f32 %v700_v41, %v216_v56  ;;  %v227_v8 = vmul.f32 %v700_v41, %v219_v63 }
  0xdf   :  { %v236_v41 = vadd.f32 %v232_v62, %v205_v3 }
  0xe0   :  { %v241_v55 = vpop.permute.xlu1 %240  ;;  %v233_v25 = vcombine.low %v226_v13, %v227_v8 }
  0xe1   :  { %v248_v53 = vsel %vm246_vm6, %v241_v55, %v243_v35  ;;  %v249_v57 = vsel %vm246_vm6, %v239_v11, %v241_v55 }
  0xe2   :  { %v255_v38 = vmul.f32 %v704_v45, %v249_v57  ;;  %v256_v6 = vmul.f32 %v704_v45, %v248_v53  ;;  %v237_v40 = vadd.f32 %v233_v25, %v206_v31 }
  0xe4   :  { %v245_v7 = vpop.permute.xlu1 %244  ;;  %v263_v16 = vcombine.low %v255_v38, %v256_v6  ;;  %v304_v38 = vpop.permute.xlu0 %303 }
  0xe5   :  { %v247_v10 = vsel %vm246_vm6, %v243_v35, %v245_v7  ;;  %v250_v12 = vsel %vm246_vm6, %v245_v7, %v239_v11 }
  0xe6   :  { %v257_v18 = vmul.f32 %v704_v45, %v247_v10  ;;  %v258_v19 = vmul.f32 %v704_v45, %v250_v12  ;;  %v267_v45 = vadd.f32 %v263_v16, %v236_v41 }
  0xe8   :  { %v272_v20 = vpop.permute.xlu1 %271  ;;  %v264_v32 = vcombine.low %v257_v18, %v258_v19 }
  0xe9   :  { %v279_v11 = vsel %vm277_vm7, %v272_v20, %v274_v15  ;;  %v280_v22 = vsel %vm277_vm7, %v270_v60, %v272_v20 }
  0xea   :  { %v286_v27 = vmul.f32 %v708_v52, %v280_v22  ;;  %v287_v28 = vmul.f32 %v708_v52, %v279_v11  ;;  %v268_v46 = vadd.f32 %v264_v32, %v237_v40 }
  0xec   :  { %v294_v2 = vcombine.low %v286_v27, %v287_v28  ;;  %v276_v34 = vpop.permute.xlu1 %275 }
  0xed   :  { %v278_v33 = vsel %vm277_vm7, %v274_v15, %v276_v34  ;;  %v281_v35 = vsel %vm277_vm7, %v276_v34, %v270_v60 }
  0xee   :  { %v298_v42 = vadd.f32 %v294_v2, %v267_v45  ;;  %v288_v23 = vmul.f32 %v708_v52, %v278_v33  ;;  %v289_v24 = vmul.f32 %v708_v52, %v281_v35 }
  0xf0   :  { %v295_v49 = vcombine.low %v288_v23, %v289_v24  ;;  %v355_v50 = vrot.slane %v298_v42, %v354_v29  ;;  %v359_v17 = vrot.slane %v298_v42, %v358_v30  ;;  %v311_v51 = vrot.slane %v298_v42, %v310_v39  ;;  %v350_v0 = vpop.permute.xlu1 %349 }
  0xf1   :  { %v315_v55 = vrot.slane %v298_v42, %v314_v36  ;;  %v451_v1 = vrot.slane %v298_v42, %v814_v26  ;;  %v455_v48 = vrot.slane %v298_v42, %v454_v44  ;;  %v403_v4 = vrot.slane %v298_v42, %v402_v43 }
  0xf2   :  { %v299_v53 = vadd.f32 %v295_v49, %v268_v46  ;;  %v375_v57 = vrot.slane %v355_v50, %v354_v29  ;;  %v379_v58 = vrot.slane %v359_v17, %v354_v29  ;;  %v331_v59 = vrot.slane %v311_v51, %v310_v39 }
  0xf3   :  { %v335_v52 = vrot.slane %v315_v55, %v310_v39  ;;  %v407_v5 = vrot.slane %v298_v42, %v406_v47  ;;  %v471_v15 = vrot.slane %v451_v1, %v814_v26  ;;  %v475_v16 = vrot.slane %v455_v48, %v814_v26 }
  0xf4   :  { %v363_v60 = vrot.slane %v299_v53, %v354_v29  ;;  %v367_v61 = vrot.slane %v299_v53, %v358_v30  ;;  %v459_v56 = vrot.slane %v299_v53, %v814_v26  ;;  %v463_v63 = vrot.slane %v299_v53, %v454_v44  ;;  %v446_v30 = vpop.permute.xlu0 %445 }
  0xf5   :  { %v319_v54 = vrot.slane %v299_v53, %v310_v39  ;;  %v323_v9 = vrot.slane %v299_v53, %v314_v36  ;;  %v388_v10 = vmul.f32 %v375_v57, %v350_v0  ;;  %v389_v12 = vmul.f32 %v379_v58, %v350_v0  ;;  %v398_v41 = vpop.permute.xlu1 %397 }
  0xf6   :  { %v383_v6 = vrot.slane %v363_v60, %v354_v29  ;;  %v387_v7 = vrot.slane %v367_v61, %v354_v29  ;;  %v344_v62 = vmul.f32 %v331_v59, %v304_v38  ;;  %v345_v13 = vmul.f32 %v335_v52, %v304_v38 }
  0xf7   :  { %v339_v3 = vrot.slane %v319_v54, %v310_v39  ;;  %v343_v14 = vrot.slane %v323_v9, %v310_v39  ;;  %v479_v18 = vrot.slane %v459_v56, %v814_v26  ;;  %v483_v19 = vrot.slane %v463_v63, %v814_v26 }
  0xf8   :  { %v390_v8 = vmul.f32 %v383_v6, %v350_v0  ;;  %v391_v37 = vmul.f32 %v387_v7, %v350_v0  ;;  %v411_v11 = vrot.slane %v299_v53, %v402_v43  ;;  %v415_v22 = vrot.slane %v299_v53, %v406_v47 }
  0xf9   :  { %v346_v20 = vmul.f32 %v339_v3, %v304_v38  ;;  %v347_v21 = vmul.f32 %v343_v14, %v304_v38  ;;  %v392_v25 = vadd.f32 %v388_v10, %v344_v62  ;;  %v393_v27 = vadd.f32 %v389_v12, %v345_v13 }
  0xfa   :  { %v423_v28 = vrot.slane %v403_v4, %v402_v43  ;;  %v427_v29 = vrot.slane %v407_v5, %v402_v43  ;;  %v431_v32 = vrot.slane %v411_v11, %v402_v43  ;;  %v435_v2 = vrot.slane %v415_v22, %v402_v43 }
  0xfb   :  { %v394_v31 = vadd.f32 %v390_v8, %v346_v20  ;;  %v395_v45 = vadd.f32 %v391_v37, %v347_v21  ;;  %v484_v36 = vmul.f32 %v471_v15, %v446_v30  ;;  %v485_v40 = vmul.f32 %v475_v16, %v446_v30 }
  0xfc   :  { %v436_v34 = vmul.f32 %v423_v28, %v398_v41  ;;  %v437_v33 = vmul.f32 %v427_v29, %v398_v41  ;;  %v438_v35 = vmul.f32 %v431_v32, %v398_v41  ;;  %v439_v39 = vmul.f32 %v435_v2, %v398_v41 }
  0xfd   :  { %v486_v24 = vmul.f32 %v479_v18, %v446_v30  ;;  %v487_v26 = vmul.f32 %v483_v19, %v446_v30 }
  0xfe   :  { %v440_v42 = vadd.f32 %v436_v34, %v392_v25  ;;  %v441_v23 = vadd.f32 %v437_v33, %v393_v27  ;;  %v442_v44 = vadd.f32 %v438_v35, %v394_v31  ;;  %v443_v46 = vadd.f32 %v439_v39, %v395_v45 }
 0x100   :  { %v488_v49 = vadd.f32 %v484_v36, %v440_v42  ;;  %v489_v50 = vadd.f32 %v485_v40, %v441_v23  ;;  %v490_v17 = vadd.f32 %v486_v24, %v442_v44  ;;  %v491_v51 = vadd.f32 %v487_v26, %v443_v46 }
 0x102   :  { %492 = vst [vmem:[#allocation5] sm:$0xff] %v488_v49  ;;  %493 = vst [vmem:[#allocation5 + $0x8] sm:$0xff] %v489_v50 }
 0x103   :  { %494 = vst [vmem:[#allocation5 + $0x10] sm:$0xff] %v490_v17  ;;  %495 = vst [vmem:[#allocation5 + $0x18] sm:$0xff] %v491_v51 }
 0x104   :  { %578 = shalt.err (!%p575_p12)
}
 0x105   :  { %s579_s11 = scalar_lea.hbm %s840_s3, 512 }
 0x106   :  { %p580_p13 = scmp.ne.s32.totalorder %s840_s3, %s579_s11  ;;  %p583_p0 = scmp.lt.u32.totalorder %s579_s11, %s840_s3 }
 0x108   :  { %p585_p1 = pnand %p583_p0, %p580_p13 }
 0x10a   :  { %588 = shalt.err (!%p585_p1)
}
 0x10b   :  { %505 = dma.vmem_to_hbm [thread:$0]  %s503_s7, 512, %s840_s3, [#allocation4]  }
 0x10c   :  { %591 = dma.done.wait [#allocation4], 512  }
 0x10d   :  { %592 = vsyncadd [#allocation4], 4294966784 }
 0x10e   :  { %509 = vsyncpa [#allocation3], 1 }
 0x10f   :  { %510 = vsyncpa [#allocation4], 1 }

</bundles_post_ra>
